<compile_context>
chip_gen: v5e
topology: v5e:2x2
jax: 0.10.0
libtpu: 0.0.40
codegen_flags: <defaults>
</compile_context>

<pallas_src>
import math

import numpy as np
import jax
import jax.numpy as jnp
from jax.experimental import pallas as pl
from jax.experimental.pallas import tpu as pltpu


_NORM0 = math.pi ** (-0.25)     # (sqrt(pi))^(-1/2) == norm_0


def _cdiv(a: int, b: int) -> int:
    return -(-a // b)


def _round_up(a: int, b: int) -> int:
    return _cdiv(a, b) * b


# --------------------------------------------------------------------------------------
# Kernel
# --------------------------------------------------------------------------------------
def _make_hermite_kernel(n_chunk: int):
    """Kernel computing one chunk of orbitals on one (TILE_M, L) tile of positions.

    Stabilized recurrence on psi_n = H_n(x) * norm_n * exp(-x^2/2):
        psi_0 = pi^(-1/4) * exp(-x^2/2)
        psi_1 = sqrt(2) * x * psi_0
        psi_n = sqrt(2/n) * x * psi_{n-1} - sqrt((n-1)/n) * psi_{n-2}
    The coefficients live in SMEM tables a_tab/b_tab (scalar prefetch) and are indexed
    with the runtime chunk base, so the orbital axis can be chunked over the grid.
    Seeding trick: at chunk 0 we set psi_{-2} := exp(-x^2/2), psi_{-1} := 0 and
    a[0] = 0, b[0] = -pi^(-1/4), so n = 0 uses the same update as every other n.
    """

    def kernel(a_ref, b_ref, x_ref, out_ref, pm1_ref, pm2_ref):
        j = pl.program_id(1)                     # orbital-chunk index (innermost axis)
        x = x_ref[...]                           # (TILE_M, L) f32 (resident across j)

        @pl.when(j == 0)
        def _():
            pm2_ref[...] = jnp.exp(-0.5 * x * x)     # psi_{-2} := Gaussian envelope (EUP)
            pm1_ref[...] = jnp.zeros_like(pm1_ref)   # psi_{-1} := 0

        base = j * n_chunk
        pm1 = pm1_ref[...]                       # psi_{n-1} carried across chunks
        pm2 = pm2_ref[...]                       # psi_{n-2}
        for k in range(n_chunk):                 # small trace-time unroll (<= max_chunk)
            a = a_ref[base + k]                  # scalar loads from SMEM
            b = b_ref[base + k]
            psi = (a * x) * pm1 - b * pm2        # f32 recurrence (VPU)
            out_ref[k] = psi.astype(out_ref.dtype)   # unmasked lane-dense (TILE_M, L) store
            pm2 = pm1
            pm1 = psi
        pm1_ref[...] = pm1
        pm2_ref[...] = pm2

    return kernel


# --------------------------------------------------------------------------------------
# Coefficient tables (SMEM scalar-prefetch operands)
# --------------------------------------------------------------------------------------
def _coef_tables(num_particles: int, n_out: int):
    n = np.arange(n_out, dtype=np.float64)
    a = np.where(n >= 1, np.sqrt(2.0 / np.maximum(n, 1.0)), 0.0)
    b = np.where(n >= 2, np.sqrt((n - 1.0) / np.maximum(n, 1.0)), 0.0)
    b[0] = -_NORM0                               # seeds psi_0 = pi^(-1/4) * env
    # padded orbital rows (beyond num_particles-1) produce zeros and are sliced off
    a[num_particles:] = 0.0
    b[num_particles:] = 0.0
    return jnp.asarray(a, jnp.float32), jnp.asarray(b, jnp.float32)


# --------------------------------------------------------------------------------------
# Wrapper
# --------------------------------------------------------------------------------------
def hermite_polynomial_matrix(x: jax.Array,
                              num_particles: int,
                              *,
                              out_dtype=jnp.float32,
                              layout: str = "torch",
                              lane_width: int = 512,
                              max_tile_rows: int | None = None,
                              max_chunk: int = 64) -> jax.Array:
    """JAX/Pallas equivalent of HermitePolynomialMatrix(num_particles)(x) for 2-D x.

    layout="torch"  -> (B, 1, P, N)  (module semantics, includes the final transpose)
    layout="native" -> (N, B, P)     (kernel-native, no transpose; ~2-3x less HBM traffic)
    out_dtype=bf16 halves store bytes of this write-bound kernel (recurrence stays f32).
    """
    assert x.ndim == 2, "expected x of shape (batch, num_positions)"
    assert layout in ("torch", "native")
    B, P = x.shape
    N = int(num_particles)
    x = x.astype(jnp.float32)

    out_dtype = jnp.dtype(out_dtype)
    out_bytes = out_dtype.itemsize
    row_align = 8 if out_bytes >= 4 else (16 if out_bytes == 2 else 32)

    total = B * P
    L = int(lane_width)
    assert L % 128 == 0, "lane_width must be a multiple of 128"
    M_raw = max(1, _cdiv(total, L))

    # ---------------- per-generation VMEM budget ----------------
    try:
        info = pltpu.get_tpu_info()
        vmem_cap = int(getattr(info, "vmem_capacity_bytes", 64 * 1024 * 1024))
    except Exception:                             # pragma: no cover - conservative fallback
        vmem_cap = 64 * 1024 * 1024               # v7x per-TC physical VMEM
    budget = min(28 * 1024 * 1024, max(12 * 1024 * 1024, vmem_cap // 2 - 4 * 1024 * 1024))

    # Per-step footprint per row of a tile:
    #   2x double-buffered f32 input + 2x f32 scratch + 2x double-buffered output chunk.
    def _rows_cap(nc: int) -> int:
        per_row = L * (4 * 4 + 2 * nc * out_bytes)
        return (budget // per_row // row_align) * row_align

    # ---------------- orbital (N) chunking ----------------
    n_chunk = max(1, min(N, int(max_chunk)))
    while n_chunk > 1 and _rows_cap(n_chunk) < row_align:
        n_chunk = max(1, n_chunk // 2)
    n_chunks = _cdiv(N, n_chunk)
    n_chunk = _cdiv(N, n_chunks)                  # balance chunk sizes
    N_out = n_chunks * n_chunk                    # >= N (tail rows are zero, sliced off)

    rows_cap = max(row_align, _rows_cap(n_chunk))
    if max_tile_rows is not None:
        rows_cap = max(row_align, min(rows_cap, (int(max_tile_rows) // row_align) * row_align))

    # ---------------- row tiling: >=2 (ideally 4-8) steps, minimal padding ----------------
    target_steps = min(8, max(1, M_raw // row_align))
    n_steps = max(target_steps, _cdiv(M_raw, rows_cap))
    TILE_M = min(rows_cap, _round_up(_cdiv(M_raw, n_steps), row_align))
    n_steps = _cdiv(M_raw, TILE_M)
    M = n_steps * TILE_M

    padded_total = M * L
    x_flat = jnp.ravel(x)
    if padded_total != total:
        x_flat = jnp.pad(x_flat, (0, padded_total - total))
    x2d = x_flat.reshape(M, L)

    a_tab, b_tab = _coef_tables(N, N_out)

    # ---------------- pallas_call ----------------
    footprint = TILE_M * L * (4 * 4 + 2 * n_chunk * out_bytes) + 64 * 1024
    vmem_limit = int(min(vmem_cap - 8 * 1024 * 1024,
                         max(32 * 1024 * 1024, footprint + 8 * 1024 * 1024)))

    cost = pl.CostEstimate(
        flops=4 * N_out * M * L,
        transcendentals=M * L,
        bytes_accessed=M * L * 4 + N_out * M * L * out_bytes,
    )

    kernel = _make_hermite_kernel(n_chunk)
    out_nml = pl.pallas_call(
        kernel,
        out_shape=jax.ShapeDtypeStruct((N_out, M, L), out_dtype),
        grid_spec=pltpu.PrefetchScalarGridSpec(
            num_scalar_prefetch=2,                       # a_tab, b_tab -> SMEM
            grid=(n_steps, n_chunks),                    # rows outer, orbital chunks inner
            in_specs=[pl.BlockSpec((TILE_M, L), lambda i, j, a, b: (i, 0))],
            out_specs=pl.BlockSpec((n_chunk, TILE_M, L), lambda i, j, a, b: (j, i, 0)),
            scratch_shapes=[pltpu.VMEM((TILE_M, L), jnp.float32),   # psi_{n-1}
                            pltpu.VMEM((TILE_M, L), jnp.float32)],  # psi_{n-2}
        ),
        compiler_params=pltpu.CompilerParams(
            dimension_semantics=("parallel", "arbitrary"),
            vmem_limit_bytes=vmem_limit),
        cost_estimate=cost,
    )(a_tab, b_tab, x2d)

    # (N_out, M, L) -> (N, B, P)
    out = out_nml[:N].reshape(N, padded_total)[:, :total].reshape(N, B, P)
    if layout == "native":
        return out                                   # fast path: no transpose
    # Module semantics: (B, 1, P, N).  This transpose re-reads/re-writes the whole output
    # (the dominant remaining HBM cost) — prefer layout="native" when the consumer allows.
    return jnp.transpose(out, (1, 2, 0))[:, None, :, :]


# --------------------------------------------------------------------------------------
# Pure-numpy (float64) reference of the PyTorch forward pass
# --------------------------------------------------------------------------------------
def _reference_numpy(x: np.ndarray, num_particles: int) -> np.ndarray:
    x = x.astype(np.float64)
    env = np.exp(-0.5 * x * x)
    outs = []
    h_prev, h_curr = None, None
    for n in range(num_particles):
        if n == 0:
            h = np.ones_like(x)
        elif n == 1:
            h = 2.0 * x
        else:
            h = 2.0 * x * h_curr - 2.0 * (n - 1) * h_prev
        h_prev, h_curr = h_curr, h
        norm = (2.0 ** n * math.factorial(n) * np.sqrt(np.pi)) ** (-0.5)
        outs.append(h * norm * env)
    stacked = np.stack(outs, axis=-1)          # (B, P, N)
    return stacked[:, None, :, :]              # (B, 1, P, N)


if __name__ == "__main__":
    key = jax.random.PRNGKey(0)

    # --- Test 1: module-sized shapes (B walkers, P = num_particles positions) ---
    num_particles = 4
    batch = 8
    x1 = jax.random.normal(key, (batch, num_particles), dtype=jnp.float32)
    out1 = jax.block_until_ready(hermite_polynomial_matrix(x1, num_particles))
    assert out1.shape == (batch, 1, num_particles, num_particles), out1.shape
    ref1 = _reference_numpy(np.asarray(x1), num_particles)
    np.testing.assert_allclose(np.asarray(out1), ref1, rtol=1e-5, atol=1e-5)

    # --- Test 2: multi row-tile grid + orbital chunking + padded-N + padded rows ---
    N2, B2, P2 = 5, 64, 33                     # 2112 elems -> 17 rows of 128, padded to 24
    x2 = jax.random.normal(jax.random.PRNGKey(1), (B2, P2), dtype=jnp.float32)
    out2 = jax.block_until_ready(
        hermite_polynomial_matrix(x2, N2, lane_width=128, max_tile_rows=8, max_chunk=2))
    assert out2.shape == (B2, 1, P2, N2), out2.shape
    ref2 = _reference_numpy(np.asarray(x2), N2)
    np.testing.assert_allclose(np.asarray(out2), ref2, rtol=1e-5, atol=1e-5)

    # --- Test 3: bf16 output fast path + native (transpose-free) layout ---
    N3, B3, P3 = 6, 16, 8
    x3 = jax.random.normal(jax.random.PRNGKey(2), (B3, P3), dtype=jnp.float32)
    out3 = jax.block_until_ready(
        hermite_polynomial_matrix(x3, N3, out_dtype=jnp.bfloat16, layout="native"))
    assert out3.shape == (N3, B3, P3), out3.shape
    ref3 = np.moveaxis(_reference_numpy(np.asarray(x3), N3)[:, 0], -1, 0)   # (N, B, P)
    np.testing.assert_allclose(np.asarray(out3, dtype=np.float32), ref3,
                               rtol=2e-2, atol=2e-2)

    print("KERNEL_OK")
</pallas_src>

<mosaic_0001>
module attributes {stable_mosaic.version = 11 : i64} {
  func.func @kernel(%arg0: i32, %arg1: i32, %arg2: memref<4xf32, #tpu.memory_space<smem>>, %arg3: memref<4xf32, #tpu.memory_space<smem>>, %arg4: memref<8x512xf32, #tpu.memory_space<vmem>>, %arg5: memref<4x8x512xf32, #tpu.memory_space<vmem>>, %arg6: memref<8x512xf32, #tpu.memory_space<vmem>>, %arg7: memref<8x512xf32, #tpu.memory_space<vmem>>) attributes {dimension_semantics = [#tpu.dimension_semantics<parallel>, #tpu.dimension_semantics<arbitrary>], iteration_bounds = array<i64: 1, 1>, scalar_prefetch = 2 : i64, scratch_operands = 2 : i64, tpu.core_type = #tpu.core_type<tc>, window_params = [{transform_indices = @transform_0, window_bounds = array<i64: 8, 512>}, {transform_indices = @transform_1, window_bounds = array<i64: 4, 8, 512>}]} {
    %c0 = arith.constant 0 : index
    %c0_0 = arith.constant 0 : index
    %0 = vector.load %arg4[%c0, %c0_0] : memref<8x512xf32, #tpu.memory_space<vmem>>, vector<8x512xf32>
    %c0_i32 = arith.constant 0 : i32
    %1 = arith.cmpi eq, %arg1, %c0_i32 : i32
    %2 = arith.extui %1 : i1 to i32
    %c0_i32_1 = arith.constant 0 : i32
    %3 = arith.cmpi ne, %2, %c0_i32_1 : i32
    scf.if %3 {
      %cst = arith.constant -5.000000e-01 : f32
      %69 = vector.broadcast %cst : f32 to vector<8x512xf32>
      %70 = arith.mulf %69, %0 : vector<8x512xf32>
      %71 = arith.mulf %70, %0 : vector<8x512xf32>
      %72 = math.exp %71 : vector<8x512xf32>
      %c0_24 = arith.constant 0 : index
      %c0_25 = arith.constant 0 : index
      %73 = vector.load %arg7[%c0_24, %c0_25] : memref<8x512xf32, #tpu.memory_space<vmem>>, vector<8x512xf32>
      tpu.vector_store %arg7[%c0_24, %c0_25], %72 {strides = array<i32>} : memref<8x512xf32, #tpu.memory_space<vmem>>, vector<8x512xf32>,
      %cst_26 = arith.constant 0.000000e+00 : f32
      %74 = vector.broadcast %cst_26 : f32 to vector<8x512xf32>
      %c0_27 = arith.constant 0 : index
      %c0_28 = arith.constant 0 : index
      %75 = vector.load %arg6[%c0_27, %c0_28] : memref<8x512xf32, #tpu.memory_space<vmem>>, vector<8x512xf32>
      tpu.vector_store %arg6[%c0_27, %c0_28], %74 {strides = array<i32>} : memref<8x512xf32, #tpu.memory_space<vmem>>, vector<8x512xf32>,
    } else {
    }
    %c4_i32 = arith.constant 4 : i32
    %4 = arith.muli %arg1, %c4_i32 : i32
    %c0_2 = arith.constant 0 : index
    %c0_3 = arith.constant 0 : index
    %5 = vector.load %arg6[%c0_2, %c0_3] : memref<8x512xf32, #tpu.memory_space<vmem>>, vector<8x512xf32>
    %c0_4 = arith.constant 0 : index
    %c0_5 = arith.constant 0 : index
    %6 = vector.load %arg7[%c0_4, %c0_5] : memref<8x512xf32, #tpu.memory_space<vmem>>, vector<8x512xf32>
    %c0_i32_6 = arith.constant 0 : i32
    %7 = arith.addi %4, %c0_i32_6 : i32
    %8 = arith.index_cast %7 : i32 to index
    %9 = memref.load %arg2[%8] : memref<4xf32, #tpu.memory_space<smem>>
    %c0_i32_7 = arith.constant 0 : i32
    %10 = arith.addi %4, %c0_i32_7 : i32
    %11 = arith.index_cast %10 : i32 to index
    %12 = memref.load %arg3[%11] : memref<4xf32, #tpu.memory_space<smem>>
    %13 = vector.broadcast %9 : f32 to vector<8x512xf32>
    %14 = arith.mulf %13, %0 : vector<8x512xf32>
    %15 = arith.mulf %14, %5 : vector<8x512xf32>
    %16 = vector.broadcast %12 : f32 to vector<8x512xf32>
    %17 = arith.mulf %16, %6 : vector<8x512xf32>
    %18 = arith.subf %15, %17 : vector<8x512xf32>
    %c0_8 = arith.constant 0 : index
    %c0_9 = arith.constant 0 : index
    %c0_10 = arith.constant 0 : index
    %19 = vector.load %arg5[%c0_8, %c0_9, %c0_10] : memref<4x8x512xf32, #tpu.memory_space<vmem>>, vector<1x8x512xf32>
    %20 = vector.shape_cast %19 : vector<1x8x512xf32> to vector<8x512xf32>
    %21 = vector.shape_cast %18 : vector<8x512xf32> to vector<1x8x512xf32>
    tpu.vector_store %arg5[%c0_8, %c0_9, %c0_10], %21 {strides = array<i32>} : memref<4x8x512xf32, #tpu.memory_space<vmem>>, vector<1x8x512xf32>,
    %c1_i32 = arith.constant 1 : i32
    %22 = arith.addi %4, %c1_i32 : i32
    %23 = arith.index_cast %22 : i32 to index
    %24 = memref.load %arg2[%23] : memref<4xf32, #tpu.memory_space<smem>>
    %c1_i32_11 = arith.constant 1 : i32
    %25 = arith.addi %4, %c1_i32_11 : i32
    %26 = arith.index_cast %25 : i32 to index
    %27 = memref.load %arg3[%26] : memref<4xf32, #tpu.memory_space<smem>>
    %28 = vector.broadcast %24 : f32 to vector<8x512xf32>
    %29 = arith.mulf %28, %0 : vector<8x512xf32>
    %30 = arith.mulf %29, %18 : vector<8x512xf32>
    %31 = vector.broadcast %27 : f32 to vector<8x512xf32>
    %32 = arith.mulf %31, %5 : vector<8x512xf32>
    %33 = arith.subf %30, %32 : vector<8x512xf32>
    %c1 = arith.constant 1 : index
    %c0_12 = arith.constant 0 : index
    %c0_13 = arith.constant 0 : index
    %34 = vector.load %arg5[%c1, %c0_12, %c0_13] : memref<4x8x512xf32, #tpu.memory_space<vmem>>, vector<1x8x512xf32>
    %35 = vector.shape_cast %34 : vector<1x8x512xf32> to vector<8x512xf32>
    %36 = vector.shape_cast %33 : vector<8x512xf32> to vector<1x8x512xf32>
    tpu.vector_store %arg5[%c1, %c0_12, %c0_13], %36 {strides = array<i32>} : memref<4x8x512xf32, #tpu.memory_space<vmem>>, vector<1x8x512xf32>,
    %c2_i32 = arith.constant 2 : i32
    %37 = arith.addi %4, %c2_i32 : i32
    %38 = arith.index_cast %37 : i32 to index
    %39 = memref.load %arg2[%38] : memref<4xf32, #tpu.memory_space<smem>>
    %c2_i32_14 = arith.constant 2 : i32
    %40 = arith.addi %4, %c2_i32_14 : i32
    %41 = arith.index_cast %40 : i32 to index
    %42 = memref.load %arg3[%41] : memref<4xf32, #tpu.memory_space<smem>>
    %43 = vector.broadcast %39 : f32 to vector<8x512xf32>
    %44 = arith.mulf %43, %0 : vector<8x512xf32>
    %45 = arith.mulf %44, %33 : vector<8x512xf32>
    %46 = vector.broadcast %42 : f32 to vector<8x512xf32>
    %47 = arith.mulf %46, %18 : vector<8x512xf32>
    %48 = arith.subf %45, %47 : vector<8x512xf32>
    %c2 = arith.constant 2 : index
    %c0_15 = arith.constant 0 : index
    %c0_16 = arith.constant 0 : index
    %49 = vector.load %arg5[%c2, %c0_15, %c0_16] : memref<4x8x512xf32, #tpu.memory_space<vmem>>, vector<1x8x512xf32>
    %50 = vector.shape_cast %49 : vector<1x8x512xf32> to vector<8x512xf32>
    %51 = vector.shape_cast %48 : vector<8x512xf32> to vector<1x8x512xf32>
    tpu.vector_store %arg5[%c2, %c0_15, %c0_16], %51 {strides = array<i32>} : memref<4x8x512xf32, #tpu.memory_space<vmem>>, vector<1x8x512xf32>,
    %c3_i32 = arith.constant 3 : i32
    %52 = arith.addi %4, %c3_i32 : i32
    %53 = arith.index_cast %52 : i32 to index
    %54 = memref.load %arg2[%53] : memref<4xf32, #tpu.memory_space<smem>>
    %c3_i32_17 = arith.constant 3 : i32
    %55 = arith.addi %4, %c3_i32_17 : i32
    %56 = arith.index_cast %55 : i32 to index
    %57 = memref.load %arg3[%56] : memref<4xf32, #tpu.memory_space<smem>>
    %58 = vector.broadcast %54 : f32 to vector<8x512xf32>
    %59 = arith.mulf %58, %0 : vector<8x512xf32>
    %60 = arith.mulf %59, %48 : vector<8x512xf32>
    %61 = vector.broadcast %57 : f32 to vector<8x512xf32>
    %62 = arith.mulf %61, %33 : vector<8x512xf32>
    %63 = arith.subf %60, %62 : vector<8x512xf32>
    %c3 = arith.constant 3 : index
    %c0_18 = arith.constant 0 : index
    %c0_19 = arith.constant 0 : index
    %64 = vector.load %arg5[%c3, %c0_18, %c0_19] : memref<4x8x512xf32, #tpu.memory_space<vmem>>, vector<1x8x512xf32>
    %65 = vector.shape_cast %64 : vector<1x8x512xf32> to vector<8x512xf32>
    %66 = vector.shape_cast %63 : vector<8x512xf32> to vector<1x8x512xf32>
    tpu.vector_store %arg5[%c3, %c0_18, %c0_19], %66 {strides = array<i32>} : memref<4x8x512xf32, #tpu.memory_space<vmem>>, vector<1x8x512xf32>,
    %c0_20 = arith.constant 0 : index
    %c0_21 = arith.constant 0 : index
    %67 = vector.load %arg6[%c0_20, %c0_21] : memref<8x512xf32, #tpu.memory_space<vmem>>, vector<8x512xf32>
    tpu.vector_store %arg6[%c0_20, %c0_21], %63 {strides = array<i32>} : memref<8x512xf32, #tpu.memory_space<vmem>>, vector<8x512xf32>,
    %c0_22 = arith.constant 0 : index
    %c0_23 = arith.constant 0 : index
    %68 = vector.load %arg7[%c0_22, %c0_23] : memref<8x512xf32, #tpu.memory_space<vmem>>, vector<8x512xf32>
    tpu.vector_store %arg7[%c0_22, %c0_23], %48 {strides = array<i32>} : memref<8x512xf32, #tpu.memory_space<vmem>>, vector<8x512xf32>,
    return
  }
  func.func @transform_0(%arg0: i32, %arg1: i32, %arg2: memref<4xf32, #tpu.memory_space<smem>>, %arg3: memref<4xf32, #tpu.memory_space<smem>>) -> (i32, i32) {
    %c0_i32 = arith.constant 0 : i32
    %c0_i32_0 = arith.constant 0 : i32
    return %arg0, %c0_i32 : i32, i32
  }
  func.func @transform_1(%arg0: i32, %arg1: i32, %arg2: memref<4xf32, #tpu.memory_space<smem>>, %arg3: memref<4xf32, #tpu.memory_space<smem>>) -> (i32, i32, i32) {
    %c0_i32 = arith.constant 0 : i32
    %c0_i32_0 = arith.constant 0 : i32
    return %arg1, %arg0, %c0_i32 : i32, i32, i32
  }
}

</mosaic_0001>

<bundles_post_ra>
// kernel: tpu_custom_call.1
= control target key start
LH: loop header
LB: loop body
LE: loop exit
PB: predicated region body
PF: predicated region fallthrough
CT: control target
= control target key end

     0   :  { %s306_s18 = smov [#allocation5]   ;;  %s307_s19 = smov [#allocation6]   ;;  %s385_s0 = inlined_call_operand.hbm [shape: f32[4], index: 0, kind: input, shape index: {}]   ;;  %s386_s2 = inlined_call_operand.hbm [shape: f32[8,512], index: 2, kind: input, shape index: {}]   ;;  %s387_s3 = inlined_call_operand.hbm [shape: f32[4,8,512], index: 3, kind: output, shape index: {}]   ;;  %s388_s1 = inlined_call_operand.hbm [shape: f32[4], index: 1, kind: input, shape index: {}]  }
   0x1   :  { %s9_s14 = sshll.u32 %s385_s0, 4  ;;  %s14_s17 = sshll.u32 %s388_s1, 4  ;;  %s10_s14 = int_to_ptr.hbm [resolvable:$true] %s9_s14  ;;  %s15_s17 = int_to_ptr.hbm [resolvable:$true] %s14_s17 }
   0x2   :  { %12 = dma.hbm_to_smem %s10_s14, 16, %s306_s18, [#allocation4] }
   0x3   :  { %17 = dma.hbm_to_smem %s15_s17, 16, %s307_s19, [#allocation4] }
   0x4   :  { %300 = dma.done.wait [#allocation4], 32 }
   0x5   :  { %301 = vsyncadd [#allocation4], 4294967264 }
   0x6   :  { %20 = sfence }
   0x7   :  { %21 = vsyncpa [#allocation8], 0 }
   0x8   :  { %22 = vsyncpa [#allocation9], 0  ;;  %s28_s22 = sshll.u32 %s386_s2, 4  ;;  %s308_s0 = smov [#allocation7]   ;;  %s29_s22 = int_to_ptr.hbm [resolvable:$true] %s28_s22 }
   0x9   :  { %s30_s23 = sshll.u32 %s308_s0, 4  ;;  %s31_s23 = int_to_ptr.vmem [resolvable:$true] %s30_s23 }
   0xa   :  { %33 = dma.hbm_to_vmem [thread:$0]  %s29_s22, 512, %s31_s23, [#allocation8]  }
   0xb   :  { %302 = dma.done.wait [#allocation8], 512  }
   0xc   :  { %303 = vsyncadd [#allocation8], 4294966784  ;;  %s79_s1 = sld [smem:[#allocation5]]  ;;  %v341_v0 = vld [vmem:[#allocation7] sm:$0xff]  ;;  %v343_v1 = vld [vmem:[#allocation7 + $0x8] sm:$0xff]  ;;  %s309_s30 = smov [#allocation10]  }
   0xd   :  { %v345_v2 = vld [vmem:[#allocation7 + $0x10] sm:$0xff]  ;;  %v46_v3 = vmul.f32 -0.5, %v341_v0  ;;  %v47_v4 = vmul.f32 -0.5, %v343_v1  ;;  %v349_v5 = vld [vmem:[#allocation7 + $0x18] sm:$0xff]  ;;  %s80_s2 = sld [smem:[#allocation6]]  ;;  %s193_s4 = sshll.u32 %s309_s30, 4  ;;  %s194_s4 = int_to_ptr.vmem [resolvable:$true] %s193_s4 }
   0xe   :  { %v48_v6 = vmul.f32 -0.5, %v345_v2  ;;  %v49_v7 = vmul.f32 -0.5, %v349_v5  ;;  %s208_s24 = sld [smem:[#allocation5 + $0x1]]  ;;  %s195_s7 = sshll.u32 %s387_s3, 4  ;;  %s196_s7 = int_to_ptr.hbm [resolvable:$true] %s195_s7 }
   0xf   :  { %v50_v8 = vmul.f32 %v46_v3, %v341_v0  ;;  %v51_v9 = vmul.f32 %v47_v4, %v343_v1  ;;  %s357_s25 = sld [smem:[#allocation6 + $0x1]]  ;;  %s310_s8 = smov 512  }
  0x10   :  { %v52_v10 = vmul.f32 %v48_v6, %v345_v2  ;;  %v53_v11 = vmul.f32 %v49_v7, %v349_v5  ;;  %s210_s26 = sld [smem:[#allocation5 + $0x2]]  ;;  %s311_s9 = smov 32  }
  0x11   :  { %v54_v12 = vmul.f32 1.442695, %v50_v8  ;;  %v56_v14 = vmul.f32 1.442695, %v51_v9  ;;  %s211_s27 = sld [smem:[#allocation6 + $0x2]] }
  0x12   :  { %v81_v13 = vstv %s79_s1  ;;  %v58_v15 = vmul.f32 1.442695, %v52_v10  ;;  %v60_v16 = vmul.f32 1.442695, %v53_v11  ;;  %s363_s28 = sld [smem:[#allocation5 + $0x3]] }
  0x13   :  { %220 = vpow2.f32 %v54_v12  ;;  %v82_v17 = vmul.f32 %v81_v13, %v341_v0  ;;  %v83_v18 = vmul.f32 %v81_v13, %v343_v1  ;;  %v84_v19 = vmul.f32 %v81_v13, %v345_v2  ;;  %s366_s29 = sld [smem:[#allocation6 + $0x3]] }
  0x14   :  { %222 = vpow2.f32 %v56_v14  ;;  %v90_v20 = vstv %s80_s2  ;;  %v85_v21 = vmul.f32 %v81_v13, %v349_v5  ;;  %v106_v22 = vstv %s208_s24 }
  0x15   :  { %224 = vpow2.f32 %v58_v15  ;;  %v86_v23 = vmul.f32 0.0, %v82_v17  ;;  %v87_v25 = vmul.f32 0.0, %v83_v18  ;;  %v115_v26 = vstv %s357_s25 }
  0x16   :  { %226 = vpow2.f32 %v60_v16  ;;  %v88_v29 = vmul.f32 0.0, %v84_v19  ;;  %v107_v30 = vmul.f32 %v106_v22, %v341_v0  ;;  %v89_v33 = vmul.f32 0.0, %v85_v21 }
  0x17   :  { %v108_v34 = vmul.f32 %v106_v22, %v343_v1  ;;  %v132_v35 = vstv %s210_s26  ;;  %v116_v39 = vmul.f32 0.0, %v115_v26  ;;  %v109_v40 = vmul.f32 %v106_v22, %v345_v2 }
  0x18   :  { %v110_v43 = vmul.f32 %v106_v22, %v349_v5  ;;  %v141_v44 = vstv %s211_s27  ;;  %v133_v47 = vmul.f32 %v132_v35, %v341_v0  ;;  %v134_v48 = vmul.f32 %v132_v35, %v343_v1 }
  0x19   :  { %v221_v24 = vpop.eup %220  ;;  %v135_v51 = vmul.f32 %v132_v35, %v345_v2  ;;  %v158_v52 = vstv %s363_s28  ;;  %v136_v56 = vmul.f32 %v132_v35, %v349_v5  ;;  %v167_v60 = vstv %s366_s29 }
  0x1a   :  { %v223_v27 = vpop.eup %222  ;;  %v91_v28 = vmul.f32 %v221_v24, %v90_v20  ;;  %v159_v3 = vmul.f32 %v158_v52, %v341_v0  ;;  %v160_v8 = vmul.f32 %v158_v52, %v343_v1  ;;  %v161_v12 = vmul.f32 %v158_v52, %v345_v2 }
  0x1b   :  { %v225_v31 = vpop.eup %224  ;;  %v92_v32 = vmul.f32 %v223_v27, %v90_v20  ;;  %v162_v16 = vmul.f32 %v158_v52, %v349_v5 }
  0x1c   :  { %v227_v36 = vpop.eup %226  ;;  %v95_v37 = vsub.f32 %v86_v23, %v91_v28  ;;  %v93_v38 = vmul.f32 %v225_v31, %v90_v20 }
  0x1d   :  { %v96_v41 = vsub.f32 %v87_v25, %v92_v32  ;;  %v94_v42 = vmul.f32 %v227_v36, %v90_v20 }
  0x1e   :  { %99 = vst [vmem:[#allocation10] sm:$0xff] %v95_v37  ;;  %v97_v45 = vsub.f32 %v88_v29, %v93_v38  ;;  %v111_v46 = vmul.f32 %v107_v30, %v95_v37  ;;  %v142_v55 = vmul.f32 %v141_v44, %v95_v37 }
  0x1f   :  { %100 = vst [vmem:[#allocation10 + $0x8] sm:$0xff] %v96_v41  ;;  %v98_v49 = vsub.f32 %v89_v33, %v94_v42  ;;  %v112_v50 = vmul.f32 %v108_v34, %v96_v41  ;;  %v143_v59 = vmul.f32 %v141_v44, %v96_v41 }
  0x20   :  { %101 = vst [vmem:[#allocation10 + $0x10] sm:$0xff] %v97_v45  ;;  %v120_v53 = vsub.f32 %v111_v46, %v116_v39  ;;  %v113_v54 = vmul.f32 %v109_v40, %v97_v45  ;;  %v144_v63 = vmul.f32 %v141_v44, %v97_v45 }
  0x21   :  { %102 = vst [vmem:[#allocation10 + $0x18] sm:$0xff] %v98_v49  ;;  %v121_v57 = vsub.f32 %v112_v50, %v116_v39  ;;  %v114_v58 = vmul.f32 %v110_v43, %v98_v49  ;;  %v145_v7 = vmul.f32 %v141_v44, %v98_v49 }
  0x22   :  { %125 = vst [vmem:[#allocation10 + $0x20] sm:$0xff] %v120_v53  ;;  %v122_v61 = vsub.f32 %v113_v54, %v116_v39  ;;  %v137_v62 = vmul.f32 %v133_v47, %v120_v53  ;;  %v168_v11 = vmul.f32 %v167_v60, %v120_v53 }
  0x23   :  { %126 = vst [vmem:[#allocation10 + $0x28] sm:$0xff] %v121_v57  ;;  %v123_v4 = vsub.f32 %v114_v58, %v116_v39  ;;  %v138_v6 = vmul.f32 %v134_v48, %v121_v57  ;;  %v169_v15 = vmul.f32 %v167_v60, %v121_v57 }
  0x24   :  { %127 = vst [vmem:[#allocation10 + $0x30] sm:$0xff] %v122_v61  ;;  %v146_v9 = vsub.f32 %v137_v62, %v142_v55  ;;  %v139_v10 = vmul.f32 %v135_v51, %v122_v61  ;;  %v170_v18 = vmul.f32 %v167_v60, %v122_v61 }
  0x25   :  { %128 = vst [vmem:[#allocation10 + $0x38] sm:$0xff] %v123_v4  ;;  %v147_v13 = vsub.f32 %v138_v6, %v143_v59  ;;  %v140_v14 = vmul.f32 %v136_v56, %v123_v4  ;;  %v171_v1 = vmul.f32 %v167_v60, %v123_v4 }
  0x26   :  { %151 = vst [vmem:[#allocation10 + $0x40] sm:$0xff] %v146_v9  ;;  %v148_v0 = vsub.f32 %v139_v10, %v144_v63  ;;  %v163_v17 = vmul.f32 %v159_v3, %v146_v9 }
  0x27   :  { %152 = vst [vmem:[#allocation10 + $0x48] sm:$0xff] %v147_v13  ;;  %v149_v19 = vsub.f32 %v140_v14, %v145_v7  ;;  %v164_v20 = vmul.f32 %v160_v8, %v147_v13 }
  0x28   :  { %153 = vst [vmem:[#allocation10 + $0x50] sm:$0xff] %v148_v0  ;;  %v172_v2 = vsub.f32 %v163_v17, %v168_v11  ;;  %v165_v21 = vmul.f32 %v161_v12, %v148_v0 }
  0x29   :  { %154 = vst [vmem:[#allocation10 + $0x58] sm:$0xff] %v149_v19  ;;  %v173_v22 = vsub.f32 %v164_v20, %v169_v15  ;;  %v166_v5 = vmul.f32 %v162_v16, %v149_v19 }
  0x2a   :  { %177 = vst [vmem:[#allocation10 + $0x60] sm:$0xff] %v172_v2  ;;  %v174_v23 = vsub.f32 %v165_v21, %v170_v18 }
  0x2b   :  { %178 = vst [vmem:[#allocation10 + $0x68] sm:$0xff] %v173_v22  ;;  %v175_v24 = vsub.f32 %v166_v5, %v171_v1 }
  0x2c   :  { %179 = vst [vmem:[#allocation10 + $0x70] sm:$0xff] %v174_v23 }
  0x2d   :  { %180 = vst [vmem:[#allocation10 + $0x78] sm:$0xff] %v175_v24 }
  0x2e   :  { %201 = dma.vmem_to_hbm [thread:$0]  %s194_s4, 2048, %s196_s7, [#allocation9], %s310_s8, %s310_s8, %s311_s9  }
  0x2f   :  { %304 = dma.done.wait [#allocation9], 2048  }
  0x30   :  { %305 = vsyncadd [#allocation9], 4294965248 }
  0x31   :  { %206 = vsyncpa [#allocation8], 1 }
  0x32   :  { %207 = vsyncpa [#allocation9], 1 }

</bundles_post_ra>
